<compile_context>
chip_gen: v6e
topology: v6e:2x2x1
jax: 0.10.0
libtpu: 0.0.40
codegen_flags: <defaults>
</compile_context>

<pallas_src>
import jax
import jax.numpy as jnp
from jax.experimental import pallas as pl
from jax.experimental.pallas import tpu as pltpu

IN_DIM = 5 + 8 + 12          # 25
IN_PAD = 32                  # fc1 contraction dim padded for aligned loads
HID = 64
N_ECON = 3                   # synthetic (see JSON notes)
N_ARMY = 5                   # synthetic (see JSON notes)
N_JOINT = N_ECON * N_ARMY    # 15 fused joint logits
OUT_W = 1 + N_JOINT          # 16 output rows: [value | flattened joint logp]
W_ROWS = HID + HID + OUT_W   # 144 rows in the packed (transposed) weight slab
LN_EPS = 1e-5                # PyTorch LayerNorm default


def _round_up(n, m):
    return ((n + m - 1) // m) * m


def _cdiv(a, b):
    return -(-a // b)


def _layernorm_cols(x, gamma, beta):
    """LayerNorm over axis 0 of x (HID, TB); single-pass mean / mean-of-squares."""
    inv_n = 1.0 / HID
    mu = jnp.sum(x, axis=0, keepdims=True) * inv_n
    ex2 = jnp.sum(x * x, axis=0, keepdims=True) * inv_n
    var = jnp.maximum(ex2 - mu * mu, 0.0)
    return (x - mu) * jax.lax.rsqrt(var + LN_EPS) * gamma + beta


def model_kernel(x_ref, w_ref, b_ref, out_ref):
    # x block: (IN_PAD, TB) f32, batch on lanes. Cast to bf16 for the MXU.
    xb = x_ref[...].astype(jnp.bfloat16)

    # Resident packed transposed weight slab (144, 64) bf16:
    #   rows [0, 64)    cols [0, 32): fc1 weight^T (cols 25:32 zero)
    #   rows [64, 128)             : fc2 weight^T
    #   rows [128, 144)            : fused head^T; row 0 = vf, rows 1..15 = joint
    w1t = w_ref[0:HID, 0:IN_PAD]                     # (64, 32)
    w2t = w_ref[HID:2 * HID, :]                      # (64, 64)
    wht = w_ref[2 * HID:2 * HID + OUT_W, :]          # (16, 64)

    # Resident bias/gamma/beta slab (64, 8) f32: cols = b1,g1,be1,b2,g2,be2,bh,0
    bs = b_ref[...]
    b1, g1, be1 = bs[:, 0:1], bs[:, 1:2], bs[:, 2:3]
    b2, g2, be2 = bs[:, 3:4], bs[:, 4:5], bs[:, 5:6]
    bh = bs[0:OUT_W, 6:7]                            # (16, 1)

    # fc1 -> LayerNorm -> ReLU          (all activations (64, TB))
    h = jnp.dot(w1t, xb, preferred_element_type=jnp.float32) + b1
    h = jnp.maximum(_layernorm_cols(h, g1, be1), 0.0)

    # fc2 -> LayerNorm -> ReLU
    h = jnp.dot(w2t, h.astype(jnp.bfloat16), preferred_element_type=jnp.float32) + b2
    h = jnp.maximum(_layernorm_cols(h, g2, be2), 0.0)

    # fused value + joint head in one MXU push: (16, 64) @ (64, TB) -> (16, TB)
    heads = jnp.dot(wht, h.astype(jnp.bfloat16),
                    preferred_element_type=jnp.float32) + bh

    # Joint log-softmax over rows 1..15 (row 0 = value, passed through unchanged).
    row = jax.lax.broadcasted_iota(jnp.int32, heads.shape, 0)
    is_logit = row >= 1
    masked = jnp.where(is_logit, heads, -jnp.inf)
    m = jnp.max(masked, axis=0, keepdims=True)               # (1, TB)
    denom = jnp.sum(jnp.exp(masked - m), axis=0, keepdims=True)
    lp = heads - m - jnp.log(denom)

    out_ref[...] = jnp.where(is_logit, lp, heads)            # (16, TB), lane-dense


def model_forward(x, params, *, tb=2048):
    """x: (B, 25) float32 -> (value (B,1), logp (B, N_ECON*N_ARMY))."""
    B, d = x.shape
    assert d == IN_DIM

    # Pad the batch only to a multiple of 128 (lane requirement), then pick a tile
    # that is a multiple of 128, <= tb, and gives >=2 grid steps when possible so
    # the "parallel" axis can shard across both TensorCores on v7x.
    b_pad0 = _round_up(B, 128)
    tb_cap = max(128, (int(tb) // 128) * 128)
    if b_pad0 <= 128:
        tb_eff, b_pad = 128, 128
    else:
        n_steps = max(2, _cdiv(b_pad0, tb_cap))
        tb_eff = _round_up(_cdiv(b_pad0, n_steps), 128)
        b_pad = tb_eff * n_steps

    # Transposed, padded input: (IN_PAD, B_pad), batch on lanes.
    xp = jnp.pad(x.astype(jnp.float32).T,
                 ((0, IN_PAD - d), (0, b_pad - B)))

    out = pl.pallas_call(
        model_kernel,
        out_shape=jax.ShapeDtypeStruct((OUT_W, b_pad), jnp.float32),
        grid=(b_pad // tb_eff,),
        in_specs=[
            pl.BlockSpec((IN_PAD, tb_eff), lambda i: (0, i)),   # batch-tiled input
            pl.BlockSpec((W_ROWS, HID), lambda i: (0, 0)),      # resident weight slab
            pl.BlockSpec((HID, 8), lambda i: (0, 0)),           # resident bias slab
        ],
        out_specs=pl.BlockSpec((OUT_W, tb_eff), lambda i: (0, i)),
        compiler_params=pltpu.CompilerParams(
            dimension_semantics=("parallel",)),                 # megacore-shardable
    )(xp, params["w"], params["b"])

    value = out[0:1, :B].T                     # (B, 1)
    logp = out[1:OUT_W, :B].T                  # (B, 15)
    return value, logp


def init_params(key):
    """PyTorch-style uniform(-1/sqrt(fan_in)) init; returns packed slabs + raw params."""
    ks = jax.random.split(key, 5)

    def lin(k, fan_in, fan_out):
        kw, kb = jax.random.split(k)
        bound = 1.0 / jnp.sqrt(float(fan_in))
        w = jax.random.uniform(kw, (fan_in, fan_out), jnp.float32, -bound, bound)
        b = jax.random.uniform(kb, (fan_out,), jnp.float32, -bound, bound)
        return w, b

    w1, b1 = lin(ks[0], IN_DIM, HID)
    w2, b2 = lin(ks[1], HID, HID)
    wv, bv = lin(ks[2], HID, 1)
    we, bwe = lin(ks[3], HID, N_ECON)
    wa, ba = lin(ks[4], HID, N_ARMY)

    ones = jnp.ones((HID,), jnp.float32)
    zeros = jnp.zeros((HID,), jnp.float32)

    # Packed transposed weight slab (144, 64), stored bf16.
    w1t = jnp.zeros((HID, HID), jnp.float32).at[:, :IN_DIM].set(w1.T)    # (64, 64)
    w2t = w2.T                                                           # (64, 64)
    w_joint = (we.T[:, None, :] + wa.T[None, :, :]).reshape(N_JOINT, HID)  # (15, 64)
    wht = jnp.concatenate([wv.T, w_joint], axis=0)                       # (16, 64)
    w_slab = jnp.concatenate([w1t, w2t, wht], axis=0).astype(jnp.bfloat16)

    # Packed bias / gamma / beta slab (64, 8), f32.
    b_joint = (bwe[:, None] + ba[None, :]).reshape(-1)                   # (15,)
    bh = jnp.zeros((HID,), jnp.float32).at[:OUT_W].set(
        jnp.concatenate([bv, b_joint]))
    b_slab = jnp.stack([b1, ones, zeros, b2, ones, zeros, bh, zeros], axis=1)

    raw = dict(w1=w1, b1=b1, g1=ones, be1=zeros,
               w2=w2, b2=b2, g2=ones, be2=zeros,
               wv=wv, bv=bv, we=we, bwe=bwe, wa=wa, ba=ba)
    return {"w": w_slab, "b": b_slab, "raw": raw}


def reference_forward(x, params):
    """Pure-JAX reference mirroring the PyTorch forward (unfused heads, two-pass LN)."""
    r = params["raw"]

    def ln(h, g, b):
        mu = jnp.mean(h, axis=-1, keepdims=True)
        var = jnp.mean((h - mu) ** 2, axis=-1, keepdims=True)
        return (h - mu) * jax.lax.rsqrt(var + LN_EPS) * g + b

    h = jnp.maximum(ln(x @ r["w1"] + r["b1"], r["g1"], r["be1"]), 0.0)
    h = jnp.maximum(ln(h @ r["w2"] + r["b2"], r["g2"], r["be2"]), 0.0)
    value = h @ r["wv"] + r["bv"]
    econ = jax.nn.log_softmax(h @ r["we"] + r["bwe"], axis=-1)
    army = jax.nn.log_softmax(h @ r["wa"] + r["ba"], axis=-1)
    logp = (econ[:, :, None] + army[:, None, :]).reshape(x.shape[0], -1)
    return value, logp


if __name__ == "__main__":
    key = jax.random.PRNGKey(0)
    k_params, k_x = jax.random.split(key)

    B = 8
    x = jax.random.normal(k_x, (B, IN_DIM), jnp.float32)
    params = init_params(k_params)

    value, logp = jax.jit(model_forward)(x, params)
    value = jax.block_until_ready(value)
    logp = jax.block_until_ready(logp)

    assert value.shape == (B, 1)
    assert logp.shape == (B, N_JOINT)
    assert bool(jnp.all(jnp.isfinite(value))) and bool(jnp.all(jnp.isfinite(logp)))

    # logp is a valid joint log-distribution -> logsumexp over all pairs == 0.
    lse = jax.scipy.special.logsumexp(logp, axis=-1)
    assert bool(jnp.all(jnp.abs(lse) < 1e-3)), lse

    # Match the pure-JAX (f32, unfused-head) reference; tolerance covers bf16 weights.
    ref_v, ref_lp = reference_forward(x, params)
    assert bool(jnp.allclose(value, ref_v, atol=5e-2, rtol=5e-2))
    assert bool(jnp.allclose(logp, ref_lp, atol=5e-2, rtol=5e-2))

    print("KERNEL_OK")
</pallas_src>

<mosaic_0001>
module attributes {stable_mosaic.version = 11 : i64} {
  func.func @model_kernel(%arg0: i32, %arg1: memref<32x128xf32, #tpu.memory_space<vmem>>, %arg2: memref<144x64xbf16, #tpu.memory_space<vmem>>, %arg3: memref<64x8xf32, #tpu.memory_space<vmem>>, %arg4: memref<16x128xf32, #tpu.memory_space<vmem>>) attributes {dimension_semantics = [#tpu.dimension_semantics<parallel>], iteration_bounds = array<i64: 1>, scalar_prefetch = 0 : i64, scratch_operands = 0 : i64, tpu.core_type = #tpu.core_type<tc>, window_params = [{transform_indices = @transform_0, window_bounds = array<i64: 32, 128>}, {pipeline_mode = #tpu.pipeline_mode<synchronous>, transform_indices = @transform_1, window_bounds = array<i64: 144, 64>}, {pipeline_mode = #tpu.pipeline_mode<synchronous>, transform_indices = @transform_2, window_bounds = array<i64: 64, 8>}, {transform_indices = @transform_3, window_bounds = array<i64: 16, 128>}]} {
    %c0 = arith.constant 0 : index
    %c0_0 = arith.constant 0 : index
    %0 = vector.load %arg1[%c0, %c0_0] : memref<32x128xf32, #tpu.memory_space<vmem>>, vector<32x128xf32>
    %1 = arith.truncf %0 : vector<32x128xf32> to vector<32x128xbf16>
    %c0_1 = arith.constant 0 : index
    %c0_2 = arith.constant 0 : index
    %2 = vector.load %arg2[%c0_1, %c0_2] : memref<144x64xbf16, #tpu.memory_space<vmem>>, vector<64x32xbf16>
    %c64 = arith.constant 64 : index
    %c0_3 = arith.constant 0 : index
    %3 = vector.load %arg2[%c64, %c0_3] : memref<144x64xbf16, #tpu.memory_space<vmem>>, vector<64x64xbf16>
    %c128 = arith.constant 128 : index
    %c0_4 = arith.constant 0 : index
    %4 = vector.load %arg2[%c128, %c0_4] : memref<144x64xbf16, #tpu.memory_space<vmem>>, vector<16x64xbf16>
    %c0_5 = arith.constant 0 : index
    %c0_6 = arith.constant 0 : index
    %5 = vector.load %arg3[%c0_5, %c0_6] : memref<64x8xf32, #tpu.memory_space<vmem>>, vector<64x8xf32>
    %6 = vector.extract_strided_slice %5 {offsets = [0, 0], sizes = [64, 1], strides = [1, 1]} : vector<64x8xf32> to vector<64x1xf32>
    %7 = vector.extract_strided_slice %5 {offsets = [0, 1], sizes = [64, 1], strides = [1, 1]} : vector<64x8xf32> to vector<64x1xf32>
    %8 = vector.extract_strided_slice %5 {offsets = [0, 2], sizes = [64, 1], strides = [1, 1]} : vector<64x8xf32> to vector<64x1xf32>
    %9 = vector.extract_strided_slice %5 {offsets = [0, 3], sizes = [64, 1], strides = [1, 1]} : vector<64x8xf32> to vector<64x1xf32>
    %10 = vector.extract_strided_slice %5 {offsets = [0, 4], sizes = [64, 1], strides = [1, 1]} : vector<64x8xf32> to vector<64x1xf32>
    %11 = vector.extract_strided_slice %5 {offsets = [0, 5], sizes = [64, 1], strides = [1, 1]} : vector<64x8xf32> to vector<64x1xf32>
    %12 = vector.extract_strided_slice %5 {offsets = [0, 6], sizes = [16, 1], strides = [1, 1]} : vector<64x8xf32> to vector<16x1xf32>
    %cst = arith.constant dense<0.000000e+00> : vector<64x128xf32>
    %13 = tpu.matmul %2, %1, %cst {dimension_numbers = #tpu.dot_dimension_numbers<[1], [0], [0], [1], [0, 0, 1, 1], [], []>} : vector<64x32xbf16>, vector<32x128xbf16>, vector<64x128xf32> -> vector<64x128xf32>
    %14 = vector.broadcast %6 : vector<64x1xf32> to vector<64x128xf32>
    %15 = arith.addf %13, %14 : vector<64x128xf32>
    %cst_7 = arith.constant dense<0.000000e+00> : vector<128xf32>
    %16 = vector.multi_reduction <add>, %15, %cst_7 [0] : vector<64x128xf32> to vector<128xf32>
    %17 = vector.shape_cast %16 : vector<128xf32> to vector<1x128xf32>
    %cst_8 = arith.constant 1.562500e-02 : f32
    %18 = vector.broadcast %cst_8 : f32 to vector<1x128xf32>
    %19 = arith.mulf %17, %18 : vector<1x128xf32>
    %20 = arith.mulf %15, %15 : vector<64x128xf32>
    %cst_9 = arith.constant dense<0.000000e+00> : vector<128xf32>
    %21 = vector.multi_reduction <add>, %20, %cst_9 [0] : vector<64x128xf32> to vector<128xf32>
    %22 = vector.shape_cast %21 : vector<128xf32> to vector<1x128xf32>
    %cst_10 = arith.constant 1.562500e-02 : f32
    %23 = vector.broadcast %cst_10 : f32 to vector<1x128xf32>
    %24 = arith.mulf %22, %23 : vector<1x128xf32>
    %25 = arith.mulf %19, %19 : vector<1x128xf32>
    %26 = arith.subf %24, %25 : vector<1x128xf32>
    %cst_11 = arith.constant 0.000000e+00 : f32
    %27 = vector.broadcast %cst_11 : f32 to vector<1x128xf32>
    %28 = arith.maximumf %26, %27 : vector<1x128xf32>
    %29 = vector.broadcast %19 : vector<1x128xf32> to vector<64x128xf32>
    %30 = arith.subf %15, %29 : vector<64x128xf32>
    %cst_12 = arith.constant 9.99999974E-6 : f32
    %31 = vector.broadcast %cst_12 : f32 to vector<1x128xf32>
    %32 = arith.addf %28, %31 : vector<1x128xf32>
    %33 = math.rsqrt %32 : vector<1x128xf32>
    %34 = vector.broadcast %33 : vector<1x128xf32> to vector<64x128xf32>
    %35 = arith.mulf %30, %34 : vector<64x128xf32>
    %36 = vector.broadcast %7 : vector<64x1xf32> to vector<64x128xf32>
    %37 = arith.mulf %35, %36 : vector<64x128xf32>
    %38 = vector.broadcast %8 : vector<64x1xf32> to vector<64x128xf32>
    %39 = arith.addf %37, %38 : vector<64x128xf32>
    %cst_13 = arith.constant 0.000000e+00 : f32
    %40 = vector.broadcast %cst_13 : f32 to vector<64x128xf32>
    %41 = arith.maximumf %39, %40 : vector<64x128xf32>
    %42 = arith.truncf %41 : vector<64x128xf32> to vector<64x128xbf16>
    %cst_14 = arith.constant dense<0.000000e+00> : vector<64x128xf32>
    %43 = tpu.matmul %3, %42, %cst_14 {dimension_numbers = #tpu.dot_dimension_numbers<[1], [0], [0], [1], [0, 0, 1, 1], [], []>} : vector<64x64xbf16>, vector<64x128xbf16>, vector<64x128xf32> -> vector<64x128xf32>
    %44 = vector.broadcast %9 : vector<64x1xf32> to vector<64x128xf32>
    %45 = arith.addf %43, %44 : vector<64x128xf32>
    %cst_15 = arith.constant dense<0.000000e+00> : vector<128xf32>
    %46 = vector.multi_reduction <add>, %45, %cst_15 [0] : vector<64x128xf32> to vector<128xf32>
    %47 = vector.shape_cast %46 : vector<128xf32> to vector<1x128xf32>
    %cst_16 = arith.constant 1.562500e-02 : f32
    %48 = vector.broadcast %cst_16 : f32 to vector<1x128xf32>
    %49 = arith.mulf %47, %48 : vector<1x128xf32>
    %50 = arith.mulf %45, %45 : vector<64x128xf32>
    %cst_17 = arith.constant dense<0.000000e+00> : vector<128xf32>
    %51 = vector.multi_reduction <add>, %50, %cst_17 [0] : vector<64x128xf32> to vector<128xf32>
    %52 = vector.shape_cast %51 : vector<128xf32> to vector<1x128xf32>
    %cst_18 = arith.constant 1.562500e-02 : f32
    %53 = vector.broadcast %cst_18 : f32 to vector<1x128xf32>
    %54 = arith.mulf %52, %53 : vector<1x128xf32>
    %55 = arith.mulf %49, %49 : vector<1x128xf32>
    %56 = arith.subf %54, %55 : vector<1x128xf32>
    %cst_19 = arith.constant 0.000000e+00 : f32
    %57 = vector.broadcast %cst_19 : f32 to vector<1x128xf32>
    %58 = arith.maximumf %56, %57 : vector<1x128xf32>
    %59 = vector.broadcast %49 : vector<1x128xf32> to vector<64x128xf32>
    %60 = arith.subf %45, %59 : vector<64x128xf32>
    %cst_20 = arith.constant 9.99999974E-6 : f32
    %61 = vector.broadcast %cst_20 : f32 to vector<1x128xf32>
    %62 = arith.addf %58, %61 : vector<1x128xf32>
    %63 = math.rsqrt %62 : vector<1x128xf32>
    %64 = vector.broadcast %63 : vector<1x128xf32> to vector<64x128xf32>
    %65 = arith.mulf %60, %64 : vector<64x128xf32>
    %66 = vector.broadcast %10 : vector<64x1xf32> to vector<64x128xf32>
    %67 = arith.mulf %65, %66 : vector<64x128xf32>
    %68 = vector.broadcast %11 : vector<64x1xf32> to vector<64x128xf32>
    %69 = arith.addf %67, %68 : vector<64x128xf32>
    %cst_21 = arith.constant 0.000000e+00 : f32
    %70 = vector.broadcast %cst_21 : f32 to vector<64x128xf32>
    %71 = arith.maximumf %69, %70 : vector<64x128xf32>
    %72 = arith.truncf %71 : vector<64x128xf32> to vector<64x128xbf16>
    %cst_22 = arith.constant dense<0.000000e+00> : vector<16x128xf32>
    %73 = tpu.matmul %4, %72, %cst_22 {dimension_numbers = #tpu.dot_dimension_numbers<[1], [0], [0], [1], [0, 0, 1, 1], [], []>} : vector<16x64xbf16>, vector<64x128xbf16>, vector<16x128xf32> -> vector<16x128xf32>
    %74 = vector.broadcast %12 : vector<16x1xf32> to vector<16x128xf32>
    %75 = arith.addf %73, %74 : vector<16x128xf32>
    %76 = tpu.iota {dimensions = array<i32: 0>} : vector<16x128xi32>
    %c1_i32 = arith.constant 1 : i32
    %77 = vector.broadcast %c1_i32 : i32 to vector<16x128xi32>
    %78 = arith.cmpi sge, %76, %77 : vector<16x128xi32>
    %cst_23 = arith.constant 0xFF800000 : f32
    %79 = vector.broadcast %cst_23 : f32 to vector<16x128xf32>
    %80 = arith.select %78, %75, %79 : vector<16x128xi1>, vector<16x128xf32>
    %cst_24 = arith.constant dense<0xFF800000> : vector<128xf32>
    %81 = vector.multi_reduction <maximumf>, %80, %cst_24 [0] : vector<16x128xf32> to vector<128xf32>
    %82 = vector.shape_cast %81 : vector<128xf32> to vector<1x128xf32>
    %83 = vector.broadcast %82 : vector<1x128xf32> to vector<16x128xf32>
    %84 = arith.subf %80, %83 : vector<16x128xf32>
    %85 = math.exp %84 : vector<16x128xf32>
    %cst_25 = arith.constant dense<0.000000e+00> : vector<128xf32>
    %86 = vector.multi_reduction <add>, %85, %cst_25 [0] : vector<16x128xf32> to vector<128xf32>
    %87 = vector.shape_cast %86 : vector<128xf32> to vector<1x128xf32>
    %88 = vector.broadcast %82 : vector<1x128xf32> to vector<16x128xf32>
    %89 = arith.subf %75, %88 : vector<16x128xf32>
    %90 = math.log %87 : vector<1x128xf32>
    %91 = vector.broadcast %90 : vector<1x128xf32> to vector<16x128xf32>
    %92 = arith.subf %89, %91 : vector<16x128xf32>
    %93 = arith.select %78, %92, %75 : vector<16x128xi1>, vector<16x128xf32>
    %c0_26 = arith.constant 0 : index
    %c0_27 = arith.constant 0 : index
    %94 = vector.load %arg4[%c0_26, %c0_27] : memref<16x128xf32, #tpu.memory_space<vmem>>, vector<16x128xf32>
    tpu.vector_store %arg4[%c0_26, %c0_27], %93 {strides = array<i32>} : memref<16x128xf32, #tpu.memory_space<vmem>>, vector<16x128xf32>,
    return
  }
  func.func @transform_0(%arg0: i32) -> (i32, i32) {
    %c0_i32 = arith.constant 0 : i32
    %c0_i32_0 = arith.constant 0 : i32
    return %c0_i32, %arg0 : i32, i32
  }
  func.func @transform_1(%arg0: i32) -> (i32, i32) {
    %c0_i32 = arith.constant 0 : i32
    %c0_i32_0 = arith.constant 0 : i32
    %c0_i32_1 = arith.constant 0 : i32
    return %c0_i32, %c0_i32_0 : i32, i32
  }
  func.func @transform_2(%arg0: i32) -> (i32, i32) {
    %c0_i32 = arith.constant 0 : i32
    %c0_i32_0 = arith.constant 0 : i32
    %c0_i32_1 = arith.constant 0 : i32
    return %c0_i32, %c0_i32_0 : i32, i32
  }
  func.func @transform_3(%arg0: i32) -> (i32, i32) {
    %c0_i32 = arith.constant 0 : i32
    %c0_i32_0 = arith.constant 0 : i32
    return %c0_i32, %arg0 : i32, i32
  }
}

</mosaic_0001>

<bundles_post_ra>
// kernel: model_forward.1
= control target key start
LH: loop header
LB: loop body
LE: loop exit
PB: predicated region body
PF: predicated region fallthrough
CT: control target
= control target key end

     0   :  { %v843_v3 = vmov 0   ;;  %vm107_vm0 = vcmask 261120   ;;  %v844_v19 = vmov 1   ;;  %v845_v20 = vmov 2   ;;  %s1093_s0 = inlined_call_operand.vmem [shape: f32[32,128], index: 0, kind: input, shape index: {}]   ;;  %s1094_s1 = inlined_call_operand.vmem [shape: bf16[144,64], index: 1, kind: input, shape index: {}]   ;;  %s1095_s2 = inlined_call_operand.vmem [shape: f32[64,8], index: 2, kind: input, shape index: {}]   ;;  %s1096_s3 = inlined_call_operand.vmem [shape: f32[16,128], index: 3, kind: output, shape index: {}]  }
   0x1   :  { %v17_v0 = vld [vmem:[%s1093_s0 + $0x10] sm:$0xff]  ;;  %v18_v1 = vld [vmem:[%s1093_s0 + $0x18] sm:$0xff]  ;;  %v15_v2 = vld [vmem:[%s1093_s0] sm:$0xff]  ;;  %797 = vset.pattern.permute.xlu0 %v843_v3  ;;  %798 = vset.pattern.permute.xlu1 %v843_v3  ;;  %vm386_vm1 = vcmask 523264   ;;  %v846_v22 = vmov 3   ;;  %v847_v23 = vmov 4  }
   0x2   :  { %v20_v4 = vpack.c.bf16 %v18_v1, %v17_v0  ;;  %v16_v5 = vld [vmem:[%s1093_s0 + $0x8] sm:$0xff]  ;;  %v824_v7 = vld [vmem:[%s1094_s1] sm:$0xff]   ;;  %v896_v9 = vld [vmem:[%s1095_s2 + $0x10] sm:$0xff]  ;;  %v848_v24 = vmov 5   ;;  %vm850_vm2 = vmmov 0  }
   0x3   :  { %v19_v6 = vpack.c.bf16 %v16_v5, %v15_v2  ;;  %752 = vmatprep.mubr.msk.bf16.mxu0 %vm107_vm0, %v824_v7  ;;  %v891_v8 = vld [vmem:[%s1095_s2] sm:$0xff]  ;;  %v825_v10 = vld [vmem:[%s1094_s1 + $0x8] sm:$0xff]   ;;  %59 = vperm.xlu1 %798, %v896_v9   ;;  %v826_v11 = vld [vmem:[%s1094_s1 + $0x10] sm:$0xff]  }
   0x4   :  { %748 = vmatprep.subr.bf16.mxu0 %v20_v4  ;;  %49 = vperm.xlu0 %797, %v891_v8   ;;  %v909_v12 = vld [vmem:[%s1095_s2 + $0x8] sm:$0xff]  ;;  %v914_v13 = vld [vmem:[%s1095_s2 + $0x18] sm:$0xff]  ;;  %v922_v14 = vld [vmem:[%s1095_s2 + $0x20] sm:$0xff] }
   0x5   :  { %749 = vmatpush3.bf16.msra.mxu0 %v20_v4  ;;  %v927_v15 = vld [vmem:[%s1095_s2 + $0x28] sm:$0xff]  ;;  %v827_v16 = vld [vmem:[%s1094_s1 + $0x18] sm:$0xff]   ;;  %v45_v17 = vld [vmem:[%s1095_s2 + $0x30] sm:$0xff] }
   0x6   :  { %750 = vmatprep.subr.bf16.mxu0 %v19_v6  ;;  %v46_v18 = vld [vmem:[%s1095_s2 + $0x38] sm:$0xff]  ;;  %v828_v21 = vld [vmem:[%s1094_s1 + $0x20] sm:$0xff]  }
   0x7   :  { %64 = vperm.xlu1 %798, %v914_v13   ;;  %768 = vmatprep.mubr.msk.bf16.mxu1 %vm386_vm1, %v828_v21 }
   0x8   :  { %54 = vperm.xlu0 %797, %v909_v12  }
   0x9   :  { %751 = vmatpush3.bf16.msra.mxu0 %v19_v6 }
   0xb   :  { %74 = vperm.xlu1 %798, %v927_v15  }
   0xc   :  { %753 = vmatmul.mubr.msk.bf16.vlgmr.msra.gmra.mxu0 %vm107_vm0, %v825_v10  ;;  %69 = vperm.xlu0 %797, %v922_v14  }
   0xd   :  { %756 = vmatprep.mubr.msk.bf16.mxu0 %vm107_vm0, %v826_v11 }
   0xf   :  { %84 = vperm.xlu1 %798, %v46_v18  }
  0x10   :  { %79 = vperm.xlu0 %797, %v45_v17  }
  0x13   :  { %800 = vset.pattern.permute.xlu1 %v844_v19 }
  0x14   :  { %757 = vmatmul.mubr.msk.bf16.gmra.mxu0 %vm107_vm0, %v827_v16  ;;  %799 = vset.pattern.permute.xlu0 %v844_v19 }
  0x15   :  { %271 = vperm.xlu1 %800, %v46_v18   ;;  %267 = vperm.xlu0 %799, %v45_v17  }
  0x19   :  { %801 = vset.pattern.permute.xlu1 %v845_v20  ;;  %251 = vperm.xlu0 %799, %v896_v9  }
  0x1a   :  { %307 = vperm.xlu1 %801, %v45_v17  }
  0x1d   :  { %804 = vset.pattern.permute.xlu0 %v845_v20 }
  0x1e   :  { %802 = vset.pattern.permute.xlu1 %v844_v19  ;;  %311 = vperm.xlu0 %804, %v46_v18  }
  0x1f   :  { %259 = vperm.xlu1 %802, %v922_v14  }
  0x22   :  { %299 = vperm.xlu0 %804, %v922_v14  }
  0x23   :  { %263 = vperm.xlu1 %802, %v927_v15  }
  0x26   :  { %295 = vperm.xlu0 %804, %v914_v13  }
  0x27   :  { %803 = vset.pattern.permute.xlu1 %v845_v20 }
  0x28   :  { %303 = vperm.xlu1 %803, %v927_v15  }
  0x2a   :  { %283 = vperm.xlu0 %804, %v891_v8  }
  0x2c   :  { %805 = vset.pattern.permute.xlu1 %v844_v19 }
  0x2d   :  { %255 = vperm.xlu1 %805, %v914_v13  }
  0x2e   :  { %809 = vset.pattern.permute.xlu0 %v846_v22 }
  0x2f   :  { %335 = vperm.xlu0 %809, %v891_v8  }
  0x31   :  { %806 = vset.pattern.permute.xlu1 %v845_v20 }
  0x32   :  { %291 = vperm.xlu1 %806, %v896_v9  }
  0x33   :  { %347 = vperm.xlu0 %809, %v914_v13  }
  0x36   :  { %807 = vset.pattern.permute.xlu1 %v844_v19 }
  0x37   :  { %243 = vperm.xlu1 %807, %v891_v8   ;;  %355 = vperm.xlu0 %809, %v927_v15  }
  0x3b   :  { %247 = vperm.xlu1 %807, %v909_v12   ;;  %363 = vperm.xlu0 %809, %v46_v18  }
  0x3f   :  { %808 = vset.pattern.permute.xlu1 %v845_v20  ;;  %814 = vset.pattern.permute.xlu0 %v848_v24 }
  0x40   :  { %287 = vperm.xlu1 %808, %v909_v12   ;;  %578 = vperm.xlu0 %814, %v922_v14  }
  0x44   :  { %810 = vset.pattern.permute.xlu1 %v846_v22  ;;  %815 = vset.pattern.permute.xlu0 %v847_v23 }
  0x45   :  { %339 = vperm.xlu1 %810, %v909_v12   ;;  %550 = vperm.xlu0 %815, %v46_v18  }
  0x49   :  { %343 = vperm.xlu1 %810, %v896_v9   ;;  %538 = vperm.xlu0 %815, %v922_v14  }
  0x4d   :  { %351 = vperm.xlu1 %810, %v922_v14   ;;  %534 = vperm.xlu0 %815, %v914_v13  }
  0x51   :  { %359 = vperm.xlu1 %810, %v45_v17   ;;  %522 = vperm.xlu0 %815, %v891_v8  }
  0x55   :  { %811 = vset.pattern.permute.xlu1 %v847_v23  ;;  %820 = vset.pattern.permute.xlu0 %v848_v24 }
  0x56   :  { %546 = vperm.xlu1 %811, %v45_v17   ;;  %562 = vperm.xlu0 %820, %v891_v8  }
  0x5a   :  { %812 = vset.pattern.permute.xlu1 %v848_v24 }
  0x5b   :  { %586 = vperm.xlu1 %812, %v45_v17  }
  0x5f   :  { %590 = vperm.xlu1 %812, %v46_v18  }
  0x63   :  { %813 = vset.pattern.permute.xlu1 %v847_v23 }
  0x64   :  { %542 = vperm.xlu1 %813, %v927_v15  }
  0x68   :  { %816 = vset.pattern.permute.xlu1 %v848_v24 }
  0x69   :  { %582 = vperm.xlu1 %816, %v927_v15  }
  0x6d   :  { %817 = vset.pattern.permute.xlu1 %v847_v23 }
  0x6e   :  { %530 = vperm.xlu1 %817, %v896_v9  }
  0x72   :  { %818 = vset.pattern.permute.xlu1 %v848_v24 }
  0x73   :  { %570 = vperm.xlu1 %818, %v896_v9  }
  0x77   :  { %574 = vperm.xlu1 %818, %v914_v13  }
  0x7b   :  { %819 = vset.pattern.permute.xlu1 %v847_v23 }
  0x7c   :  { %526 = vperm.xlu1 %819, %v909_v12  }
  0x7e   :  { %v60_v25 = vpop.permute.xlu1 %59 }
  0x7f   :  { %v50_v26 = vpop.permute.xlu0 %49 }
  0x80   :  { %821 = vset.pattern.permute.xlu1 %v848_v24 }
  0x81   :  { %566 = vperm.xlu1 %821, %v909_v12  }
  0x82   :  { %v65_v27 = vpop.permute.xlu1 %64 }
  0x83   :  { %v55_v29 = vpop.permute.xlu0 %54 }
  0x86   :  { %v75_v30 = vpop.permute.xlu1 %74 }
  0x87   :  { %v70_v35 = vpop.permute.xlu0 %69 }
  0x8a   :  { %v85_v37 = vpop.permute.xlu1 %84 }
  0x8b   :  { %v80_v51 = vpop.permute.xlu0 %79 }
  0x90   :  { %v999_v49 = vpop.permute.xlu1 %271 }
  0x95   :  { %v1011_v1 = vpop.permute.xlu1 %307 }
  0x9a   :  { %v260_v11 = vpop.permute.xlu1 %259 }
  0x9e   :  { %v264_v19 = vpop.permute.xlu1 %263 }
  0xcc   :  { %v754_v28 = vpop.f32.mrf.mxu0 }
  0xcd   :  { %v980_v36 = vadd.f32 %v754_v28, %v60_v25  ;;  %v268_v28 = vpop.permute.xlu0 %267 }
  0xce   :  { %v154_v31 = vpop.f32.mrf.mxu0 }
  0xcf   :  { %v976_v33 = vadd.f32 %v154_v31, %v50_v26  ;;  %v201_v45 = vmul.f32 %v980_v36, %v980_v36 }
  0xd0   :  { %v755_v32 = vpop.f32.mrf.mxu0 }
  0xd1   :  { %v199_v40 = vmul.f32 %v976_v33, %v976_v33  ;;  %v988_v41 = vadd.f32 %v755_v32, %v65_v27  ;;  %v304_v27 = vpop.permute.xlu1 %303 }
  0xd2   :  { %v157_v34 = vpop.f32.mrf.mxu0 }
  0xd3   :  { %v982_v38 = vadd.f32 %v157_v34, %v55_v29  ;;  %v202_v52 = vmul.f32 %v988_v41, %v988_v41  ;;  %v252_v34 = vpop.permute.xlu0 %251 }
  0xd4   :  { %v758_v39 = vpop.f32.mrf.mxu0 }
  0xd5   :  { %v185_v42 = vadd.f32 %v982_v38, %v976_v33  ;;  %v200_v43 = vmul.f32 %v982_v38, %v982_v38  ;;  %v1006_v55 = vadd.f32 %v758_v39, %v80_v51  ;;  %v256_v24 = vpop.permute.xlu1 %255 }
  0xd6   :  { %v170_v44 = vpop.f32.mrf.mxu0 }
  0xd7   :  { %v186_v46 = vadd.f32 %v185_v42, %v980_v36  ;;  %v207_v47 = vadd.f32 %v200_v43, %v199_v40  ;;  %v997_v48 = vadd.f32 %v170_v44, %v70_v35  ;;  %v205_v2 = vmul.f32 %v1006_v55, %v1006_v55  ;;  %v312_v39 = vpop.permute.xlu0 %311 }
  0xd8   :  { %v759_v50 = vpop.f32.mrf.mxu0 }
  0xd9   :  { %v208_v53 = vadd.f32 %v207_v47, %v201_v45  ;;  %v187_v54 = vadd.f32 %v186_v46, %v988_v41  ;;  %v203_v58 = vmul.f32 %v997_v48, %v997_v48  ;;  %v182_v62 = vadd.f32 %v759_v50, %v85_v37  ;;  %v292_v37 = vpop.permute.xlu1 %291 }
  0xda   :  { %v173_v56 = vpop.f32.mrf.mxu0 }
  0xdb   :  { %v188_v57 = vadd.f32 %v187_v54, %v997_v48  ;;  %v209_v59 = vadd.f32 %v208_v53, %v202_v52  ;;  %v174_v60 = vadd.f32 %v173_v56, %v75_v30  ;;  %v206_v5 = vmul.f32 %v182_v62, %v182_v62  ;;  %v300_v42 = vpop.permute.xlu0 %299 }
  0xdd   :  { %v210_v61 = vadd.f32 %v209_v59, %v203_v58  ;;  %v189_v63 = vadd.f32 %v188_v57, %v174_v60  ;;  %v204_v0 = vmul.f32 %v174_v60, %v174_v60  ;;  %v244_v40 = vpop.permute.xlu1 %243 }
  0xdf   :  { %v190_v3 = vadd.f32 %v189_v63, %v1006_v55  ;;  %v211_v4 = vadd.f32 %v210_v61, %v204_v0  ;;  %v296_v63 = vpop.permute.xlu0 %295 }
  0xe1   :  { %v191_v6 = vadd.f32 %v190_v3, %v182_v62  ;;  %v212_v7 = vadd.f32 %v211_v4, %v205_v2  ;;  %v248_v59 = vpop.permute.xlu1 %247 }
  0xe3   :  { %v192_v9 = vrot.slane %v191_v6, 4  ;;  %v213_v10 = vadd.f32 %v212_v7, %v206_v5 }
  0xe5   :  { %v193_v14 = vadd.f32 %v192_v9, %v191_v6  ;;  %v214_v15 = vrot.slane %v213_v10, 4 }
  0xe7   :  { %v194_v13 = vrot.slane %v193_v14, 2  ;;  %v215_v16 = vadd.f32 %v214_v15, %v213_v10 }
  0xe9   :  { %v195_v17 = vadd.f32 %v194_v13, %v193_v14  ;;  %v216_v18 = vrot.slane %v215_v16, 2 }
  0xeb   :  { %v196_v20 = vrot.slane %v195_v17, 1  ;;  %v217_v21 = vadd.f32 %v216_v18, %v215_v16 }
  0xed   :  { %v197_v22 = vadd.f32 %v196_v20, %v195_v17  ;;  %v218_v23 = vrot.slane %v217_v21, 1  ;;  %v288_v17 = vpop.permute.xlu1 %287 }
  0xef   :  { %v198_v25 = vmul.f32 0.015625, %v197_v22  ;;  %v219_v26 = vadd.f32 %v218_v23, %v217_v21 }
  0xf1   :  { %v220_v29 = vmul.f32 0.015625, %v219_v26  ;;  %v221_v30 = vmul.f32 %v198_v25, %v198_v25  ;;  %v231_v43 = vsub.f32 %v182_v62, %v198_v25  ;;  %v228_v44 = vsub.f32 %v997_v48, %v198_v25 }
  0xf2   :  { %v229_v45 = vsub.f32 %v174_v60, %v198_v25  ;;  %v230_v46 = vsub.f32 %v1006_v55, %v198_v25  ;;  %v227_v50 = vsub.f32 %v988_v41, %v198_v25  ;;  %v226_v51 = vsub.f32 %v980_v36, %v198_v25 }
  0xf3   :  { %v222_v31 = vsub.f32 %v220_v29, %v221_v30  ;;  %v224_v52 = vsub.f32 %v976_v33, %v198_v25  ;;  %v225_v53 = vsub.f32 %v982_v38, %v198_v25  ;;  %v831_v29 = vld [vmem:[%s1094_s1 + $0x38] sm:$0xff]   ;;  %v849_v30 = vmov 0.0  }
  0xf4   :  { %776 = vmatprep.subr.bf16.mxu0 %v849_v30  ;;  %784 = vmatprep.mubr.msk.bf16.mxu0 %vm850_vm2, %v849_v30 }
  0xf5   :  { %v223_v32 = vmax.f32 %v222_v31, 0.0  ;;  %v851_v31 = vmov 6  }
  0xf6   :  { %822 = vset.pattern.permute.xlu1 %v851_v31  ;;  %823 = vset.pattern.permute.xlu0 %v851_v31 }
  0xf7   :  { %v232_v35 = vadd.f32 1e-05, %v223_v32  ;;  %614 = vperm.xlu1 %822, %v891_v8   ;;  %618 = vperm.xlu0 %823, %v909_v12   ;;  %v340_v32 = vpop.permute.xlu1 %339 }
  0xf9   :  { %833 = vrsqrt.f32 %v232_v35 }
 0x106   :  { %v834_v47 = vpop.eup %833 }
 0x107   :  { %v241_v54 = vmul.f32 %v834_v47, %v231_v43  ;;  %v238_v56 = vmul.f32 %v834_v47, %v228_v44  ;;  %v239_v57 = vmul.f32 %v834_v47, %v229_v45  ;;  %v240_v58 = vmul.f32 %v834_v47, %v230_v46 }
 0x108   :  { %v237_v61 = vmul.f32 %v834_v47, %v227_v50  ;;  %v236_v62 = vmul.f32 %v834_v47, %v226_v51  ;;  %v234_v48 = vmul.f32 %v834_v47, %v224_v52  ;;  %v235_v60 = vmul.f32 %v834_v47, %v225_v53 }
 0x109   :  { %v281_v55 = vmul.f32 %v999_v49, %v241_v54  ;;  %v278_v0 = vmul.f32 %v260_v11, %v238_v56  ;;  %v279_v41 = vmul.f32 %v264_v19, %v239_v57  ;;  %v280_v2 = vmul.f32 %v268_v28, %v240_v58  ;;  %v284_v49 = vpop.permute.xlu0 %283  ;;  %v830_v28 = vld [vmem:[%s1094_s1 + $0x30] sm:$0xff]  }
 0x10a   :  { %v277_v36 = vmul.f32 %v256_v24, %v237_v61  ;;  %v276_v3 = vmul.f32 %v252_v34, %v236_v62  ;;  %v274_v7 = vmul.f32 %v244_v40, %v234_v48  ;;  %v275_v9 = vmul.f32 %v248_v59, %v235_v60  ;;  %v344_v24 = vpop.permute.xlu1 %343 }
 0x10b   :  { %v319_v33 = vadd.f32 %v304_v27, %v279_v41  ;;  %v320_v38 = vadd.f32 %v1011_v1, %v280_v2  ;;  %v321_v4 = vadd.f32 %v312_v39, %v281_v55  ;;  %v318_v5 = vadd.f32 %v300_v42, %v278_v0  ;;  %v829_v27 = vld [vmem:[%s1094_s1 + $0x28] sm:$0xff]  }
 0x10c   :  { %v316_v6 = vadd.f32 %v292_v37, %v276_v3  ;;  %v317_v10 = vadd.f32 %v296_v63, %v277_v36  ;;  %v315_v18 = vadd.f32 %v288_v17, %v275_v9  ;;  %v314_v22 = vadd.f32 %v284_v49, %v274_v7 }
 0x10d   :  { %v327_v14 = vmax.f32 %v319_v33, 0.0  ;;  %v328_v15 = vmax.f32 %v320_v38, 0.0  ;;  %v329_v13 = vmax.f32 %v321_v4, 0.0  ;;  %v326_v16 = vmax.f32 %v318_v5, 0.0  ;;  %v336_v34 = vpop.permute.xlu0 %335 }
 0x10e   :  { %v324_v19 = vmax.f32 %v316_v6, 0.0  ;;  %v325_v21 = vmax.f32 %v317_v10, 0.0  ;;  %v323_v23 = vmax.f32 %v315_v18, 0.0  ;;  %v322_v25 = vmax.f32 %v314_v22, 0.0  ;;  %v352_v39 = vpop.permute.xlu1 %351 }
 0x10f   :  { %v333_v11 = vpack.c.bf16 %v329_v13, %v328_v15  ;;  %v332_v20 = vpack.c.bf16 %v327_v14, %v326_v16 }
 0x110   :  { %v331_v1 = vpack.c.bf16 %v325_v21, %v324_v19  ;;  %v330_v26 = vpack.c.bf16 %v323_v23, %v322_v25 }
 0x111   :  { %760 = vmatprep.subr.bf16.mxu1 %v333_v11  ;;  %v348_v40 = vpop.permute.xlu0 %347 }
 0x112   :  { %761 = vmatpush3.bf16.msra.mxu1 %v333_v11  ;;  %v360_v12 = vpop.permute.xlu1 %359 }
 0x113   :  { %762 = vmatprep.subr.bf16.mxu1 %v332_v20 }
 0x115   :  { %v356_v53 = vpop.permute.xlu0 %355 }
 0x116   :  { %763 = vmatpush3.bf16.msra.mxu1 %v332_v20  ;;  %v1067_v63 = vpop.permute.xlu1 %546 }
 0x117   :  { %764 = vmatprep.subr.bf16.mxu1 %v331_v1 }
 0x119   :  { %v364_v33 = vpop.permute.xlu0 %363 }
 0x11a   :  { %765 = vmatpush3.bf16.msra.mxu1 %v331_v1  ;;  %v587_v14 = vpop.permute.xlu1 %586 }
 0x11b   :  { %766 = vmatprep.subr.bf16.mxu1 %v330_v26 }
 0x11e   :  { %767 = vmatpush3.bf16.msra.mxu1 %v330_v26  ;;  %v591_v19 = vpop.permute.xlu1 %590 }
 0x121   :  { %769 = vmatmul.mubr.msk.bf16.vlgmr.msra.gmra.mxu1 %vm386_vm1, %v829_v27 }
 0x122   :  { %772 = vmatprep.mubr.msk.bf16.mxu1 %vm386_vm1, %v830_v28  ;;  %v543_v26 = vpop.permute.xlu1 %542 }
 0x129   :  { %773 = vmatmul.mubr.msk.bf16.gmra.mxu1 %vm386_vm1, %v831_v29 }
 0x1e1   :  { %v770_v35 = vpop.f32.mrf.mxu1 }
 0x1e2   :  { %v1047_v45 = vadd.f32 %v770_v35, %v344_v24  ;;  %v579_v35 = vpop.permute.xlu0 %578 }
 0x1e3   :  { %v433_v37 = vpop.f32.mrf.mxu1 }
 0x1e4   :  { %v1045_v43 = vadd.f32 %v433_v37, %v336_v34  ;;  %v480_v56 = vmul.f32 %v1047_v45, %v1047_v45  ;;  %v583_v34 = vpop.permute.xlu1 %582 }
 0x1e5   :  { %v771_v42 = vpop.f32.mrf.mxu1 }
 0x1e6   :  { %v478_v8 = vmul.f32 %v1045_v43, %v1045_v43  ;;  %v1053_v50 = vadd.f32 %v771_v42, %v348_v40 }
 0x1e7   :  { %v436_v44 = vpop.f32.mrf.mxu1 }
 0x1e8   :  { %v1049_v46 = vadd.f32 %v436_v44, %v340_v32  ;;  %v481_v62 = vmul.f32 %v1053_v50, %v1053_v50  ;;  %v531_v42 = vpop.permute.xlu1 %530  ;;  %v551_v44 = vpop.permute.xlu0 %550 }
 0x1e9   :  { %v774_v47 = vpop.f32.mrf.mxu1 }
 0x1ea   :  { %v464_v51 = vadd.f32 %v1049_v46, %v1045_v43  ;;  %v479_v52 = vmul.f32 %v1049_v46, %v1049_v46  ;;  %v458_v55 = vadd.f32 %v774_v47, %v360_v12 }
 0x1eb   :  { %v449_v54 = vpop.f32.mrf.mxu1 }
 0x1ec   :  { %v465_v57 = vadd.f32 %v464_v51, %v1047_v45  ;;  %v486_v58 = vadd.f32 %v479_v52, %v478_v8  ;;  %v1062_v59 = vadd.f32 %v449_v54, %v352_v39  ;;  %v484_v7 = vmul.f32 %v458_v55, %v458_v55  ;;  %v571_v47 = vpop.permute.xlu1 %570  ;;  %v539_v8 = vpop.permute.xlu0 %538 }
 0x1ed   :  { %v775_v61 = vpop.f32.mrf.mxu1 }
 0x1ee   :  { %v487_v48 = vadd.f32 %v486_v58, %v480_v56  ;;  %v466_v60 = vadd.f32 %v465_v57, %v1053_v50  ;;  %v482_v2 = vmul.f32 %v1062_v59, %v1062_v59  ;;  %v461_v4 = vadd.f32 %v775_v61, %v364_v33 }
 0x1ef   :  { %v452_v0 = vpop.f32.mrf.mxu1 }
 0x1f0   :  { %v467_v41 = vadd.f32 %v466_v60, %v1062_v59  ;;  %v488_v36 = vadd.f32 %v487_v48, %v481_v62  ;;  %v453_v3 = vadd.f32 %v452_v0, %v356_v53  ;;  %v485_v15 = vmul.f32 %v461_v4, %v461_v4  ;;  %v575_v12 = vpop.permute.xlu1 %574  ;;  %v535_v51 = vpop.permute.xlu0 %534 }
 0x1f2   :  { %v489_v38 = vadd.f32 %v488_v36, %v482_v2  ;;  %v468_v5 = vadd.f32 %v467_v41, %v453_v3  ;;  %v483_v6 = vmul.f32 %v453_v3, %v453_v3 }
 0x1f4   :  { %v469_v9 = vadd.f32 %v468_v5, %v458_v55  ;;  %v490_v10 = vadd.f32 %v489_v38, %v483_v6 }
 0x1f6   :  { %v470_v13 = vadd.f32 %v469_v9, %v461_v4  ;;  %v491_v16 = vadd.f32 %v490_v10, %v484_v7 }
 0x1f8   :  { %v471_v17 = vrot.slane %v470_v13, 4  ;;  %v492_v49 = vadd.f32 %v491_v16, %v485_v15 }
 0x1fa   :  { %v472_v11 = vadd.f32 %v471_v17, %v470_v13  ;;  %v493_v18 = vrot.slane %v492_v49, 4 }
 0x1fc   :  { %v473_v20 = vrot.slane %v472_v11, 2  ;;  %v494_v21 = vadd.f32 %v493_v18, %v492_v49 }
 0x1fe   :  { %v474_v22 = vadd.f32 %v473_v20, %v472_v11  ;;  %v495_v1 = vrot.slane %v494_v21, 2 }
 0x200   :  { %v475_v23 = vrot.slane %v474_v22, 1  ;;  %v496_v25 = vadd.f32 %v495_v1, %v494_v21 }
 0x202   :  { %v476_v27 = vadd.f32 %v475_v23, %v474_v22  ;;  %v497_v28 = vrot.slane %v496_v25, 1 }
 0x204   :  { %v477_v29 = vmul.f32 0.015625, %v476_v27  ;;  %v498_v31 = vadd.f32 %v497_v28, %v496_v25 }
 0x206   :  { %v499_v32 = vmul.f32 0.015625, %v498_v31  ;;  %v500_v24 = vmul.f32 %v477_v29, %v477_v29  ;;  %v509_v52 = vsub.f32 %v458_v55, %v477_v29  ;;  %v508_v53 = vsub.f32 %v453_v3, %v477_v29  ;;  %v832_v31 = vld [vmem:[%s1094_s1 + $0x40] sm:$0xff]  }
 0x207   :  { %v510_v54 = vsub.f32 %v461_v4, %v477_v29  ;;  %v505_v56 = vsub.f32 %v1047_v45, %v477_v29  ;;  %v507_v58 = vsub.f32 %v1062_v59, %v477_v29  ;;  %v506_v61 = vsub.f32 %v1053_v50, %v477_v29  ;;  %v527_v45 = vpop.permute.xlu1 %526  ;;  %v523_v59 = vpop.permute.xlu0 %522 }
 0x208   :  { %v501_v37 = vsub.f32 %v499_v32, %v500_v24  ;;  %v503_v36 = vsub.f32 %v1045_v43, %v477_v29  ;;  %v504_v33 = vsub.f32 %v1049_v46, %v477_v29  ;;  %v670_v32 = vlaneseq }
 0x20a   :  { %v502_v39 = vmax.f32 %v501_v37, 0.0 }
 0x20b   :  { %v567_v21 = vpop.permute.xlu1 %566  ;;  %v563_v22 = vpop.permute.xlu0 %562 }
 0x20c   :  { %v511_v40 = vadd.f32 1e-05, %v502_v39 }
 0x20e   :  { %835 = vrsqrt.f32 %v511_v40 }
 0x20f   :  { %v615_v24 = vpop.permute.xlu1 %614  ;;  %v619_v40 = vpop.permute.xlu0 %618 }
 0x21b   :  { %v836_v57 = vpop.eup %835 }
 0x21c   :  { %v519_v62 = vmul.f32 %v836_v57, %v509_v52  ;;  %v518_v48 = vmul.f32 %v836_v57, %v508_v53  ;;  %v520_v60 = vmul.f32 %v836_v57, %v510_v54  ;;  %v515_v0 = vmul.f32 %v836_v57, %v505_v56 }
 0x21d   :  { %v517_v41 = vmul.f32 %v836_v57, %v507_v58  ;;  %v516_v2 = vmul.f32 %v836_v57, %v506_v61  ;;  %v513_v6 = vmul.f32 %v836_v57, %v503_v36  ;;  %v514_v50 = vmul.f32 %v836_v57, %v504_v33 }
 0x21e   :  { %v559_v55 = vmul.f32 %v1067_v63, %v519_v62  ;;  %v558_v3 = vmul.f32 %v543_v26, %v518_v48  ;;  %v560_v38 = vmul.f32 %v551_v44, %v520_v60  ;;  %v555_v4 = vmul.f32 %v531_v42, %v515_v0 }
 0x21f   :  { %v557_v5 = vmul.f32 %v539_v8, %v517_v41  ;;  %v556_v15 = vmul.f32 %v535_v51, %v516_v2  ;;  %v553_v49 = vmul.f32 %v523_v59, %v513_v6  ;;  %v554_v46 = vmul.f32 %v527_v45, %v514_v50 }
 0x220   :  { %v599_v7 = vadd.f32 %v587_v14, %v559_v55  ;;  %v598_v9 = vadd.f32 %v583_v34, %v558_v3  ;;  %v600_v10 = vadd.f32 %v591_v19, %v560_v38  ;;  %v595_v43 = vadd.f32 %v571_v47, %v555_v4 }
 0x221   :  { %v597_v13 = vadd.f32 %v579_v35, %v557_v5  ;;  %v596_v20 = vadd.f32 %v575_v12, %v556_v15  ;;  %v594_v1 = vadd.f32 %v567_v21, %v554_v46  ;;  %v593_v25 = vadd.f32 %v563_v22, %v553_v49 }
 0x222   :  { %v607_v16 = vmax.f32 %v599_v7, 0.0  ;;  %v608_v17 = vmax.f32 %v600_v10, 0.0  ;;  %v606_v11 = vmax.f32 %v598_v9, 0.0  ;;  %v603_v23 = vmax.f32 %v595_v43, 0.0 }
 0x223   :  { %v605_v18 = vmax.f32 %v597_v13, 0.0  ;;  %v604_v19 = vmax.f32 %v596_v20, 0.0  ;;  %v602_v27 = vmax.f32 %v594_v1, 0.0  ;;  %v601_v28 = vmax.f32 %v593_v25, 0.0 }
 0x224   :  { %v612_v63 = vpack.c.bf16 %v608_v17, %v607_v16  ;;  %v671_v34 = vshrl.u32 %v670_v32, 7 }
 0x225   :  { %v611_v14 = vpack.c.bf16 %v606_v11, %v605_v18  ;;  %v610_v26 = vpack.c.bf16 %v604_v19, %v603_v23  ;;  %v609_v29 = vpack.c.bf16 %v602_v27, %v601_v28 }
 0x226   :  { %777 = vmatpush3.bf16.msra.mxu0 %v612_v63  ;;  %vm673_vm3 = vcmp.ge.s32.totalorder %v671_v34, 1 }
 0x227   :  { %778 = vmatprep.subr.bf16.mxu0 %v849_v30 }
 0x22a   :  { %779 = vmatpush3.bf16.msra.mxu0 %v611_v14 }
 0x22b   :  { %780 = vmatprep.subr.bf16.mxu0 %v849_v30 }
 0x22e   :  { %781 = vmatpush3.bf16.msra.mxu0 %v610_v26 }
 0x22f   :  { %782 = vmatprep.subr.bf16.mxu0 %v849_v30 }
 0x232   :  { %783 = vmatpush3.bf16.msra.mxu0 %v609_v29 }
 0x235   :  { %785 = vmatmul.mubr.msk.bf16.vlgmr.msra.gmra.mxu0 %vm386_vm1, %v832_v31 }
 0x2f5   :  { %v663_v35 = vpop.f32.mrf.mxu0 }
 0x2f6   :  { %v664_v37 = vadd.f32 %v663_v35, %v615_v24 }
 0x2f7   :  { %v786_v39 = vpop.f32.mrf.mxu0 }
 0x2f8   :  { %v675_v30 = vsel %vm673_vm3, %v664_v37, -inf }
 0x2f9   :  { %v666_v42 = vpop.f32.mrf.mxu0 }
 0x2fa   :  { %v667_v44 = vadd.f32 %v666_v42, %v619_v40 }
 0x2fb   :  { %v787_v47 = vpop.f32.mrf.mxu0 }
 0x2fc   :  { %v677_v8 = vmax.f32 %v675_v30, %v667_v44 }
 0x2fe   :  { %v678_v12 = vrot.slane %v677_v8, 4 }
 0x300   :  { %v679_v51 = vmax.f32 %v677_v8, %v678_v12 }
 0x302   :  { %v680_v52 = vrot.slane %v679_v51, 2 }
 0x304   :  { %v681_v53 = vmax.f32 %v679_v51, %v680_v52 }
 0x306   :  { %v682_v54 = vrot.slane %v681_v53, 1 }
 0x308   :  { %v683_v56 = vmax.f32 %v681_v53, %v682_v54 }
 0x30a   :  { %v684_v57 = vsub.f32 %v675_v30, %v683_v56  ;;  %v685_v58 = vsub.f32 %v667_v44, %v683_v56  ;;  %v697_v45 = vsub.f32 %v664_v37, %v683_v56 }
 0x30c   :  { %v686_v61 = vmul.f32 1.442695, %v684_v57  ;;  %v688_v62 = vmul.f32 1.442695, %v685_v58 }
 0x30e   :  { %837 = vpow2.f32 %v686_v61 }
 0x30f   :  { %839 = vpow2.f32 %v688_v62 }
 0x31b   :  { %v838_v48 = vpop.eup %837 }
 0x31c   :  { %v840_v60 = vpop.eup %839 }
 0x31d   :  { %v690_v0 = vadd.f32 %v840_v60, %v838_v48 }
 0x31f   :  { %v691_v41 = vrot.slane %v690_v0, 4 }
 0x321   :  { %v692_v2 = vadd.f32 %v691_v41, %v690_v0 }
 0x323   :  { %v693_v36 = vrot.slane %v692_v2, 2 }
 0x325   :  { %v694_v33 = vadd.f32 %v693_v36, %v692_v2 }
 0x327   :  { %v695_v55 = vrot.slane %v694_v33, 1 }
 0x329   :  { %v696_v3 = vadd.f32 %v695_v55, %v694_v33 }
 0x32b   :  { %841 = vlog2.f32 %v696_v3 }
 0x338   :  { %v842_v38 = vpop.eup %841 }
 0x339   :  { %v700_v4 = vmul.f32 0.6931472, %v842_v38 }
 0x33b   :  { %v701_v5 = vsub.f32 %v697_v45, %v700_v4  ;;  %v702_v59 = vsub.f32 %v685_v58, %v700_v4 }
 0x33d   :  { %v703_v6 = vsel %vm673_vm3, %v701_v5, %v664_v37  ;;  %706 = vst [vmem:[%s1096_s3 + $0x8] sm:$0xff] %v702_v59 }
 0x33e   :  { %705 = vst [vmem:[%s1096_s3] sm:$0xff] %v703_v6 }

</bundles_post_ra>
